<compile_context>
chip_gen: v6e
topology: v6e:2x2x1
jax: 0.10.0
libtpu: 0.0.40
codegen_flags: <defaults>
</compile_context>

<pallas_src>
import functools
import math

import jax
import jax.numpy as jnp
from jax.experimental import pallas as pl
from jax.experimental.pallas import tpu as pltpu


def _double_conv_kernel(x_ref, w1_ref, b1_ref, w2_ref, b2_ref, m_ref, o_ref, *, H, W):
    """One batch element per grid step.

    x_ref : (1, Cin, H*W)   flattened NCHW input
    w1_ref: (Cout, 9*Cin)   conv1 weights, columns ordered (ky, kx, ci)
    b1_ref: (Cout, 1)       conv1 bias
    w2_ref: (Cout, 9*Cout)  conv2 weights
    b2_ref: (Cout, 1)       conv2 bias
    m_ref : (9, 1, H*W)     0/1 border-validity masks per tap (implicit zero padding)
    o_ref : (1, Cout, H*W)  flattened NCHW output
    """
    HW = H * W
    inv_sqrt2 = 1.0 / math.sqrt(2.0)

    # Hoist the 9 masks once; shared by both convs.
    masks = [m_ref[t] for t in range(9)]  # each (1, HW)

    def conv3x3_gelu(x, w_ref, b_ref):
        # x: (C, HW) f32. Build im2col (9*C, HW) from 9 lane rolls + masks, then one
        # MXU contraction with K = 9*C and a lane-dense N = HW result.
        taps = []
        t = 0
        for dy in (-1, 0, 1):
            for dx in (-1, 0, 1):
                off = dy * W + dx
                shifted = x if off == 0 else pltpu.roll(x, shift=(-off) % HW, axis=1)
                taps.append(shifted * masks[t])          # zero out out-of-image taps
                t += 1
        patches = jnp.concatenate(taps, axis=0)          # (9*C, HW)
        acc = jnp.dot(w_ref[...], patches,
                      preferred_element_type=jnp.float32)  # (Cout, HW)
        acc = acc + b_ref[...]                           # bias broadcast over lanes
        # Exact (erf-based) GELU, matching torch.nn.GELU() defaults.
        return 0.5 * acc * (1.0 + jax.lax.erf(acc * inv_sqrt2))

    x = x_ref[0].astype(jnp.float32)                     # (Cin, HW)
    h = conv3x3_gelu(x, w1_ref, b1_ref)                  # (Cout, HW) -- stays on-chip
    y = conv3x3_gelu(h, w2_ref, b2_ref)                  # (Cout, HW)
    o_ref[0] = y.astype(o_ref.dtype)


@jax.jit
def double_conv(x_nchw, w1, b1, w2, b2):
    """DoubleConv forward. x: (N, Cin, H, W); weights in PyTorch OIHW layout."""
    N, Cin, H, W = x_nchw.shape
    Cout = w1.shape[0]
    HW = H * W

    # Flatten spatial dims (free reshape of a contiguous NCHW buffer).
    x_flat = x_nchw.reshape(N, Cin, HW)

    # OIHW -> (Cout, ky, kx, ci) -> (Cout, 9*Cin): column order matches the kernel's
    # patch-matrix row order (tap-major, channel-minor).
    w1r = jnp.transpose(w1, (0, 2, 3, 1)).reshape(Cout, 9 * Cin)
    w2r = jnp.transpose(w2, (0, 2, 3, 1)).reshape(Cout, 9 * Cout)
    b1r = b1.reshape(Cout, 1)
    b2r = b2.reshape(Cout, 1)

    # 0/1 validity masks per tap (implicit zero padding). Computed once here to keep
    # integer div/mod out of the kernel; 9*HW floats is negligible traffic.
    pos = jnp.arange(HW, dtype=jnp.int32)
    r = pos // W
    c = pos % W
    mask_list = []
    for dy in (-1, 0, 1):
        for dx in (-1, 0, 1):
            valid = (r + dy >= 0) & (r + dy < H) & (c + dx >= 0) & (c + dx < W)
            mask_list.append(valid)
    masks = jnp.stack(mask_list, axis=0).astype(x_nchw.dtype).reshape(9, 1, HW)

    kernel = functools.partial(_double_conv_kernel, H=H, W=W)
    out_flat = pl.pallas_call(
        kernel,
        out_shape=jax.ShapeDtypeStruct((N, Cout, HW), x_nchw.dtype),
        grid=(N,),
        in_specs=[
            pl.BlockSpec((1, Cin, HW), lambda n: (n, 0, 0)),
            pl.BlockSpec((Cout, 9 * Cin), lambda n: (0, 0)),
            pl.BlockSpec((Cout, 1), lambda n: (0, 0)),
            pl.BlockSpec((Cout, 9 * Cout), lambda n: (0, 0)),
            pl.BlockSpec((Cout, 1), lambda n: (0, 0)),
            pl.BlockSpec((9, 1, HW), lambda n: (0, 0, 0)),
        ],
        out_specs=pl.BlockSpec((1, Cout, HW), lambda n: (n, 0, 0)),
        compiler_params=pltpu.CompilerParams(dimension_semantics=("parallel",)),
    )(x_flat, w1r, b1r, w2r, b2r, masks)

    return out_flat.reshape(N, Cout, H, W)


def _reference_double_conv(x, w1, b1, w2, b2):
    """Pure-JAX reference (lax.conv, NCHW/OIHW) for correctness checking."""
    def conv_gelu(x, w, b):
        out = jax.lax.conv_general_dilated(
            x, w, window_strides=(1, 1), padding=((1, 1), (1, 1)),
            dimension_numbers=("NCHW", "OIHW", "NCHW"),
        ) + b.reshape(1, -1, 1, 1)
        return 0.5 * out * (1.0 + jax.lax.erf(out / jnp.sqrt(2.0).astype(out.dtype)))

    return conv_gelu(conv_gelu(x, w1, b1), w2, b2)


if __name__ == "__main__":
    # Small shapes consistent with the module's forward (NCHW, PyTorch weight layout).
    N, Cin, Cout, H, W = 2, 4, 8, 16, 16

    key = jax.random.PRNGKey(0)
    kx, kw1, kb1, kw2, kb2 = jax.random.split(key, 5)

    x = jax.random.normal(kx, (N, Cin, H, W), dtype=jnp.float32)

    # Deterministic fan-in scaled init, stored in PyTorch OIHW layout.
    s1 = 1.0 / math.sqrt(Cin * 3 * 3)
    s2 = 1.0 / math.sqrt(Cout * 3 * 3)
    w1 = jax.random.uniform(kw1, (Cout, Cin, 3, 3), jnp.float32, -s1, s1)
    b1 = jax.random.uniform(kb1, (Cout,), jnp.float32, -s1, s1)
    w2 = jax.random.uniform(kw2, (Cout, Cout, 3, 3), jnp.float32, -s2, s2)
    b2 = jax.random.uniform(kb2, (Cout,), jnp.float32, -s2, s2)

    out = jax.block_until_ready(double_conv(x, w1, b1, w2, b2))

    ref = jax.block_until_ready(_reference_double_conv(x, w1, b1, w2, b2))
    assert out.shape == (N, Cout, H, W)
    assert jnp.allclose(out, ref, atol=1e-4, rtol=1e-4), "mismatch vs JAX reference"

    print("KERNEL_OK")
</pallas_src>

<mosaic_0001>
module attributes {stable_mosaic.version = 11 : i64} {
  func.func @_double_conv_kernel(%arg0: i32, %arg1: memref<1x4x256xf32, #tpu.memory_space<vmem>>, %arg2: memref<8x36xf32, #tpu.memory_space<vmem>>, %arg3: memref<8x1xf32, #tpu.memory_space<vmem>>, %arg4: memref<8x72xf32, #tpu.memory_space<vmem>>, %arg5: memref<8x1xf32, #tpu.memory_space<vmem>>, %arg6: memref<9x1x256xf32, #tpu.memory_space<vmem>>, %arg7: memref<1x8x256xf32, #tpu.memory_space<vmem>>) attributes {dimension_semantics = [#tpu.dimension_semantics<parallel>], iteration_bounds = array<i64: 2>, scalar_prefetch = 0 : i64, scratch_operands = 0 : i64, tpu.core_type = #tpu.core_type<tc>, window_params = [{transform_indices = @transform_0, window_bounds = array<i64: 1, 4, 256>}, {pipeline_mode = #tpu.pipeline_mode<synchronous>, transform_indices = @transform_1, window_bounds = array<i64: 8, 36>}, {pipeline_mode = #tpu.pipeline_mode<synchronous>, transform_indices = @transform_2, window_bounds = array<i64: 8, 1>}, {pipeline_mode = #tpu.pipeline_mode<synchronous>, transform_indices = @transform_3, window_bounds = array<i64: 8, 72>}, {pipeline_mode = #tpu.pipeline_mode<synchronous>, transform_indices = @transform_4, window_bounds = array<i64: 8, 1>}, {pipeline_mode = #tpu.pipeline_mode<synchronous>, transform_indices = @transform_5, window_bounds = array<i64: 9, 1, 256>}, {transform_indices = @transform_6, window_bounds = array<i64: 1, 8, 256>}]} {
    %c0 = arith.constant 0 : index
    %c0_0 = arith.constant 0 : index
    %c0_1 = arith.constant 0 : index
    %0 = vector.load %arg6[%c0, %c0_0, %c0_1] : memref<9x1x256xf32, #tpu.memory_space<vmem>>, vector<1x1x256xf32>
    %1 = vector.shape_cast %0 : vector<1x1x256xf32> to vector<1x256xf32>
    %c1 = arith.constant 1 : index
    %c0_2 = arith.constant 0 : index
    %c0_3 = arith.constant 0 : index
    %2 = vector.load %arg6[%c1, %c0_2, %c0_3] : memref<9x1x256xf32, #tpu.memory_space<vmem>>, vector<1x1x256xf32>
    %3 = vector.shape_cast %2 : vector<1x1x256xf32> to vector<1x256xf32>
    %c2 = arith.constant 2 : index
    %c0_4 = arith.constant 0 : index
    %c0_5 = arith.constant 0 : index
    %4 = vector.load %arg6[%c2, %c0_4, %c0_5] : memref<9x1x256xf32, #tpu.memory_space<vmem>>, vector<1x1x256xf32>
    %5 = vector.shape_cast %4 : vector<1x1x256xf32> to vector<1x256xf32>
    %c3 = arith.constant 3 : index
    %c0_6 = arith.constant 0 : index
    %c0_7 = arith.constant 0 : index
    %6 = vector.load %arg6[%c3, %c0_6, %c0_7] : memref<9x1x256xf32, #tpu.memory_space<vmem>>, vector<1x1x256xf32>
    %7 = vector.shape_cast %6 : vector<1x1x256xf32> to vector<1x256xf32>
    %c4 = arith.constant 4 : index
    %c0_8 = arith.constant 0 : index
    %c0_9 = arith.constant 0 : index
    %8 = vector.load %arg6[%c4, %c0_8, %c0_9] : memref<9x1x256xf32, #tpu.memory_space<vmem>>, vector<1x1x256xf32>
    %9 = vector.shape_cast %8 : vector<1x1x256xf32> to vector<1x256xf32>
    %c5 = arith.constant 5 : index
    %c0_10 = arith.constant 0 : index
    %c0_11 = arith.constant 0 : index
    %10 = vector.load %arg6[%c5, %c0_10, %c0_11] : memref<9x1x256xf32, #tpu.memory_space<vmem>>, vector<1x1x256xf32>
    %11 = vector.shape_cast %10 : vector<1x1x256xf32> to vector<1x256xf32>
    %c6 = arith.constant 6 : index
    %c0_12 = arith.constant 0 : index
    %c0_13 = arith.constant 0 : index
    %12 = vector.load %arg6[%c6, %c0_12, %c0_13] : memref<9x1x256xf32, #tpu.memory_space<vmem>>, vector<1x1x256xf32>
    %13 = vector.shape_cast %12 : vector<1x1x256xf32> to vector<1x256xf32>
    %c7 = arith.constant 7 : index
    %c0_14 = arith.constant 0 : index
    %c0_15 = arith.constant 0 : index
    %14 = vector.load %arg6[%c7, %c0_14, %c0_15] : memref<9x1x256xf32, #tpu.memory_space<vmem>>, vector<1x1x256xf32>
    %15 = vector.shape_cast %14 : vector<1x1x256xf32> to vector<1x256xf32>
    %c8 = arith.constant 8 : index
    %c0_16 = arith.constant 0 : index
    %c0_17 = arith.constant 0 : index
    %16 = vector.load %arg6[%c8, %c0_16, %c0_17] : memref<9x1x256xf32, #tpu.memory_space<vmem>>, vector<1x1x256xf32>
    %17 = vector.shape_cast %16 : vector<1x1x256xf32> to vector<1x256xf32>
    %c0_18 = arith.constant 0 : index
    %c0_19 = arith.constant 0 : index
    %c0_20 = arith.constant 0 : index
    %18 = vector.load %arg1[%c0_18, %c0_19, %c0_20] : memref<1x4x256xf32, #tpu.memory_space<vmem>>, vector<1x4x256xf32>
    %19 = vector.shape_cast %18 : vector<1x4x256xf32> to vector<4x256xf32>
    %c17_i32 = arith.constant 17 : i32
    %20 = tpu.dynamic_rotate %19 by %c17_i32 dim 1 : vector<4x256xf32>, i32 -> vector<4x256xf32>
    %21 = vector.broadcast %1 : vector<1x256xf32> to vector<4x256xf32>
    %22 = arith.mulf %20, %21 : vector<4x256xf32>
    %c16_i32 = arith.constant 16 : i32
    %23 = tpu.dynamic_rotate %19 by %c16_i32 dim 1 : vector<4x256xf32>, i32 -> vector<4x256xf32>
    %24 = vector.broadcast %3 : vector<1x256xf32> to vector<4x256xf32>
    %25 = arith.mulf %23, %24 : vector<4x256xf32>
    %c15_i32 = arith.constant 15 : i32
    %26 = tpu.dynamic_rotate %19 by %c15_i32 dim 1 : vector<4x256xf32>, i32 -> vector<4x256xf32>
    %27 = vector.broadcast %5 : vector<1x256xf32> to vector<4x256xf32>
    %28 = arith.mulf %26, %27 : vector<4x256xf32>
    %c1_i32 = arith.constant 1 : i32
    %29 = tpu.dynamic_rotate %19 by %c1_i32 dim 1 : vector<4x256xf32>, i32 -> vector<4x256xf32>
    %30 = vector.broadcast %7 : vector<1x256xf32> to vector<4x256xf32>
    %31 = arith.mulf %29, %30 : vector<4x256xf32>
    %32 = vector.broadcast %9 : vector<1x256xf32> to vector<4x256xf32>
    %33 = arith.mulf %19, %32 : vector<4x256xf32>
    %c255_i32 = arith.constant 255 : i32
    %34 = tpu.dynamic_rotate %19 by %c255_i32 dim 1 : vector<4x256xf32>, i32 -> vector<4x256xf32>
    %35 = vector.broadcast %11 : vector<1x256xf32> to vector<4x256xf32>
    %36 = arith.mulf %34, %35 : vector<4x256xf32>
    %c241_i32 = arith.constant 241 : i32
    %37 = tpu.dynamic_rotate %19 by %c241_i32 dim 1 : vector<4x256xf32>, i32 -> vector<4x256xf32>
    %38 = vector.broadcast %13 : vector<1x256xf32> to vector<4x256xf32>
    %39 = arith.mulf %37, %38 : vector<4x256xf32>
    %c240_i32 = arith.constant 240 : i32
    %40 = tpu.dynamic_rotate %19 by %c240_i32 dim 1 : vector<4x256xf32>, i32 -> vector<4x256xf32>
    %41 = vector.broadcast %15 : vector<1x256xf32> to vector<4x256xf32>
    %42 = arith.mulf %40, %41 : vector<4x256xf32>
    %c239_i32 = arith.constant 239 : i32
    %43 = tpu.dynamic_rotate %19 by %c239_i32 dim 1 : vector<4x256xf32>, i32 -> vector<4x256xf32>
    %44 = vector.broadcast %17 : vector<1x256xf32> to vector<4x256xf32>
    %45 = arith.mulf %43, %44 : vector<4x256xf32>
    %46 = tpu.concatenate %22, %25, %28, %31, %33, %36, %39, %42, %45 in 0 : vector<4x256xf32>, vector<4x256xf32>, vector<4x256xf32>, vector<4x256xf32>, vector<4x256xf32>, vector<4x256xf32>, vector<4x256xf32>, vector<4x256xf32>, vector<4x256xf32> -> vector<36x256xf32>
    %c0_21 = arith.constant 0 : index
    %c0_22 = arith.constant 0 : index
    %47 = vector.load %arg2[%c0_21, %c0_22] : memref<8x36xf32, #tpu.memory_space<vmem>>, vector<8x36xf32>
    %cst = arith.constant dense<0.000000e+00> : vector<8x256xf32>
    %48 = tpu.matmul %47, %46, %cst {dimension_numbers = #tpu.dot_dimension_numbers<[1], [0], [0], [1], [0, 0, 1, 1], [], []>} : vector<8x36xf32>, vector<36x256xf32>, vector<8x256xf32> -> vector<8x256xf32>
    %c0_23 = arith.constant 0 : index
    %c0_24 = arith.constant 0 : index
    %49 = vector.load %arg3[%c0_23, %c0_24] : memref<8x1xf32, #tpu.memory_space<vmem>>, vector<8x1xf32>
    %50 = vector.broadcast %49 : vector<8x1xf32> to vector<8x256xf32>
    %51 = arith.addf %48, %50 : vector<8x256xf32>
    %cst_25 = arith.constant 5.000000e-01 : f32
    %52 = vector.broadcast %cst_25 : f32 to vector<8x256xf32>
    %53 = arith.mulf %52, %51 : vector<8x256xf32>
    %cst_26 = arith.constant 0.707106769 : f32
    %54 = vector.broadcast %cst_26 : f32 to vector<8x256xf32>
    %55 = arith.mulf %51, %54 : vector<8x256xf32>
    %56 = math.erf %55 : vector<8x256xf32>
    %cst_27 = arith.constant 1.000000e+00 : f32
    %57 = vector.broadcast %cst_27 : f32 to vector<8x256xf32>
    %58 = arith.addf %57, %56 : vector<8x256xf32>
    %59 = arith.mulf %53, %58 : vector<8x256xf32>
    %c17_i32_28 = arith.constant 17 : i32
    %60 = tpu.dynamic_rotate %59 by %c17_i32_28 dim 1 : vector<8x256xf32>, i32 -> vector<8x256xf32>
    %61 = vector.broadcast %1 : vector<1x256xf32> to vector<8x256xf32>
    %62 = arith.mulf %60, %61 : vector<8x256xf32>
    %c16_i32_29 = arith.constant 16 : i32
    %63 = tpu.dynamic_rotate %59 by %c16_i32_29 dim 1 : vector<8x256xf32>, i32 -> vector<8x256xf32>
    %64 = vector.broadcast %3 : vector<1x256xf32> to vector<8x256xf32>
    %65 = arith.mulf %63, %64 : vector<8x256xf32>
    %c15_i32_30 = arith.constant 15 : i32
    %66 = tpu.dynamic_rotate %59 by %c15_i32_30 dim 1 : vector<8x256xf32>, i32 -> vector<8x256xf32>
    %67 = vector.broadcast %5 : vector<1x256xf32> to vector<8x256xf32>
    %68 = arith.mulf %66, %67 : vector<8x256xf32>
    %c1_i32_31 = arith.constant 1 : i32
    %69 = tpu.dynamic_rotate %59 by %c1_i32_31 dim 1 : vector<8x256xf32>, i32 -> vector<8x256xf32>
    %70 = vector.broadcast %7 : vector<1x256xf32> to vector<8x256xf32>
    %71 = arith.mulf %69, %70 : vector<8x256xf32>
    %72 = vector.broadcast %9 : vector<1x256xf32> to vector<8x256xf32>
    %73 = arith.mulf %59, %72 : vector<8x256xf32>
    %c255_i32_32 = arith.constant 255 : i32
    %74 = tpu.dynamic_rotate %59 by %c255_i32_32 dim 1 : vector<8x256xf32>, i32 -> vector<8x256xf32>
    %75 = vector.broadcast %11 : vector<1x256xf32> to vector<8x256xf32>
    %76 = arith.mulf %74, %75 : vector<8x256xf32>
    %c241_i32_33 = arith.constant 241 : i32
    %77 = tpu.dynamic_rotate %59 by %c241_i32_33 dim 1 : vector<8x256xf32>, i32 -> vector<8x256xf32>
    %78 = vector.broadcast %13 : vector<1x256xf32> to vector<8x256xf32>
    %79 = arith.mulf %77, %78 : vector<8x256xf32>
    %c240_i32_34 = arith.constant 240 : i32
    %80 = tpu.dynamic_rotate %59 by %c240_i32_34 dim 1 : vector<8x256xf32>, i32 -> vector<8x256xf32>
    %81 = vector.broadcast %15 : vector<1x256xf32> to vector<8x256xf32>
    %82 = arith.mulf %80, %81 : vector<8x256xf32>
    %c239_i32_35 = arith.constant 239 : i32
    %83 = tpu.dynamic_rotate %59 by %c239_i32_35 dim 1 : vector<8x256xf32>, i32 -> vector<8x256xf32>
    %84 = vector.broadcast %17 : vector<1x256xf32> to vector<8x256xf32>
    %85 = arith.mulf %83, %84 : vector<8x256xf32>
    %86 = tpu.concatenate %62, %65, %68, %71, %73, %76, %79, %82, %85 in 0 : vector<8x256xf32>, vector<8x256xf32>, vector<8x256xf32>, vector<8x256xf32>, vector<8x256xf32>, vector<8x256xf32>, vector<8x256xf32>, vector<8x256xf32>, vector<8x256xf32> -> vector<72x256xf32>
    %c0_36 = arith.constant 0 : index
    %c0_37 = arith.constant 0 : index
    %87 = vector.load %arg4[%c0_36, %c0_37] : memref<8x72xf32, #tpu.memory_space<vmem>>, vector<8x72xf32>
    %cst_38 = arith.constant dense<0.000000e+00> : vector<8x256xf32>
    %88 = tpu.matmul %87, %86, %cst_38 {dimension_numbers = #tpu.dot_dimension_numbers<[1], [0], [0], [1], [0, 0, 1, 1], [], []>} : vector<8x72xf32>, vector<72x256xf32>, vector<8x256xf32> -> vector<8x256xf32>
    %c0_39 = arith.constant 0 : index
    %c0_40 = arith.constant 0 : index
    %89 = vector.load %arg5[%c0_39, %c0_40] : memref<8x1xf32, #tpu.memory_space<vmem>>, vector<8x1xf32>
    %90 = vector.broadcast %89 : vector<8x1xf32> to vector<8x256xf32>
    %91 = arith.addf %88, %90 : vector<8x256xf32>
    %cst_41 = arith.constant 5.000000e-01 : f32
    %92 = vector.broadcast %cst_41 : f32 to vector<8x256xf32>
    %93 = arith.mulf %92, %91 : vector<8x256xf32>
    %cst_42 = arith.constant 0.707106769 : f32
    %94 = vector.broadcast %cst_42 : f32 to vector<8x256xf32>
    %95 = arith.mulf %91, %94 : vector<8x256xf32>
    %96 = math.erf %95 : vector<8x256xf32>
    %cst_43 = arith.constant 1.000000e+00 : f32
    %97 = vector.broadcast %cst_43 : f32 to vector<8x256xf32>
    %98 = arith.addf %97, %96 : vector<8x256xf32>
    %99 = arith.mulf %93, %98 : vector<8x256xf32>
    %c0_44 = arith.constant 0 : index
    %c0_45 = arith.constant 0 : index
    %c0_46 = arith.constant 0 : index
    %100 = vector.load %arg7[%c0_44, %c0_45, %c0_46] : memref<1x8x256xf32, #tpu.memory_space<vmem>>, vector<1x8x256xf32>
    %101 = vector.shape_cast %100 : vector<1x8x256xf32> to vector<8x256xf32>
    %102 = vector.shape_cast %99 : vector<8x256xf32> to vector<1x8x256xf32>
    tpu.vector_store %arg7[%c0_44, %c0_45, %c0_46], %102 {strides = array<i32>} : memref<1x8x256xf32, #tpu.memory_space<vmem>>, vector<1x8x256xf32>,
    return
  }
  func.func @transform_0(%arg0: i32) -> (i32, i32, i32) {
    %c0_i32 = arith.constant 0 : i32
    %c0_i32_0 = arith.constant 0 : i32
    %c0_i32_1 = arith.constant 0 : i32
    return %arg0, %c0_i32, %c0_i32_0 : i32, i32, i32
  }
  func.func @transform_1(%arg0: i32) -> (i32, i32) {
    %c0_i32 = arith.constant 0 : i32
    %c0_i32_0 = arith.constant 0 : i32
    %c0_i32_1 = arith.constant 0 : i32
    return %c0_i32, %c0_i32_0 : i32, i32
  }
  func.func @transform_2(%arg0: i32) -> (i32, i32) {
    %c0_i32 = arith.constant 0 : i32
    %c0_i32_0 = arith.constant 0 : i32
    %c0_i32_1 = arith.constant 0 : i32
    return %c0_i32, %c0_i32_0 : i32, i32
  }
  func.func @transform_3(%arg0: i32) -> (i32, i32) {
    %c0_i32 = arith.constant 0 : i32
    %c0_i32_0 = arith.constant 0 : i32
    %c0_i32_1 = arith.constant 0 : i32
    return %c0_i32, %c0_i32_0 : i32, i32
  }
  func.func @transform_4(%arg0: i32) -> (i32, i32) {
    %c0_i32 = arith.constant 0 : i32
    %c0_i32_0 = arith.constant 0 : i32
    %c0_i32_1 = arith.constant 0 : i32
    return %c0_i32, %c0_i32_0 : i32, i32
  }
  func.func @transform_5(%arg0: i32) -> (i32, i32, i32) {
    %c0_i32 = arith.constant 0 : i32
    %c0_i32_0 = arith.constant 0 : i32
    %c0_i32_1 = arith.constant 0 : i32
    %c0_i32_2 = arith.constant 0 : i32
    return %c0_i32, %c0_i32_0, %c0_i32_1 : i32, i32, i32
  }
  func.func @transform_6(%arg0: i32) -> (i32, i32, i32) {
    %c0_i32 = arith.constant 0 : i32
    %c0_i32_0 = arith.constant 0 : i32
    %c0_i32_1 = arith.constant 0 : i32
    return %arg0, %c0_i32, %c0_i32_0 : i32, i32, i32
  }
}

</mosaic_0001>

<bundles_post_ra>
// kernel: double_conv.1
= control target key start
LH: loop header
LB: loop body
LE: loop exit
PB: predicated region body
PF: predicated region fallthrough
CT: control target
= control target key end

     0   :  { %s904_s21 = smov 0   ;;  %s1187_s0 = inlined_call_operand.vmem [shape: f32[2,4,256], index: 0, kind: input, shape index: {}]   ;;  %s1188_s1 = inlined_call_operand.vmem [shape: f32[8,36], index: 1, kind: input, shape index: {}]   ;;  %s1189_s2 = inlined_call_operand.vmem [shape: f32[8,1], index: 2, kind: input, shape index: {}]   ;;  %s1190_s3 = inlined_call_operand.vmem [shape: f32[8,72], index: 3, kind: input, shape index: {}]   ;;  %s1191_s4 = inlined_call_operand.vmem [shape: f32[8,1], index: 4, kind: input, shape index: {}]   ;;  %s1192_s5 = inlined_call_operand.vmem [shape: f32[9,1,256], index: 5, kind: input, shape index: {}]   ;;  %s1193_s6 = inlined_call_operand.vmem [shape: f32[2,8,256], index: 6, kind: output, shape index: {}]  }
   0x1 LB: > { %s798_s22 = sadd.s32 4294967295, %s857_s21   ;;  %p802_p0 = scmp.ge.s32.totalorder %s857_s21, 1  ;;  %s857_s21 = sphi %s904_s21, %s16_s21  }
   0x2   : > { %p212_p1 = scmp.lt.s32.totalorder %s857_s21, 3 }
   0x4   : > { %p213_p2 = pnand %p802_p0, %p212_p1 }
   0x5   : > { %p242_p3 = scmp.lt.s32.totalorder (!%p213_p2), %s798_s22, 1  ;;  %s859_s27 = smov (!%p213_p2), 111  }
   0x6   : > { %216 = sbr.rel (%p213_p2) target bundleno = 749 (0x2ed), region = 44  ;;  %s860_s28 = smov (!%p213_p2), 112  }
   0x7   : > { %s861_s29 = smov (!%p213_p2), 127   ;;  %s862_s30 = smov (!%p213_p2), 113  }
   0x8   : > { %s863_s7 = smov (!%p213_p2), 1   ;;  %s864_s8 = smov (!%p213_p2), 16  }
   0x9   : > { %s867_s9 = smov (!%p213_p2), 15   ;;  %s868_s10 = smov (!%p213_p2), 17  }
   0xb   : > { %s1195_s22 = smov (!%p242_p3, %s798_s22), 1  ;;  %v865_v2 = vmov 0.0   ;;  %v866_v3 = vmov 0   ;;  %v484_v4 = vld [vmem:[%s1189_s2] sm:$0xff]  ;;  %v277_v5 = vlaneseq  ;;  %v810_v7 = vld [vmem:[%s1192_s5 + $0x8] sm:$0x3] }
   0xc   : > { %s821_s23 = sshll.u32 %s1195_s22, 3  ;;  %564 = vmatprep.mubr.f32.mxu0 %v865_v2  ;;  %724 = vmatprep.mubr.f32.mxu1 %v865_v2  ;;  %v814_v11 = vld [vmem:[%s1192_s5 + $0x10] sm:$0x3]  ;;  %v811_v18 = vld [vmem:[%s1192_s5 + $0xa] sm:$0x3]  ;;  %vm474_vm1 = vcmask 1043456  }
   0xd   : > { %s246_s26 = scalar_lea.vmem %s1187_s0, %s821_s23  ;;  %841 = vset.pattern.permute.xlu0 %v866_v3  ;;  %v284_v6 = vshrl.u32 %v277_v5, 7  ;;  %v952_v8 = vand.u32 127, %v277_v5  ;;  %v813_v19 = vld [vmem:[%s1192_s5 + $0xe] sm:$0x3]  ;;  %v812_v26 = vld [vmem:[%s1192_s5 + $0xc] sm:$0x3] }
   0xe   : > { %v918_v0 = vld [vmem:[%s246_s26] sm:$0xff]  ;;  %vm490_vm9 = vcmask 293888   ;;  %vm656_vm10 = vcmask 588800  }
   0xf   : > { %427 = vrot.lane.b32.xlu1 %v918_v0, %s859_s27  ;;  %407 = vrot.lane.b32.xlu0 %v918_v0, %s860_s28  ;;  %v271_v1 = vcombine.high %v918_v0, %v918_v0  ;;  %v954_v9 = vsub.s32 0, %v284_v6  ;;  %v956_v10 = vsub.s32 1, %v284_v6  ;;  %vm431_vm0 = vcmp.lt.s32.totalorder %v952_v8, 111  ;;  %v809_v55 = vld [vmem:[%s1192_s5 + $0x6] sm:$0x3] }
  0x10   : > { %vm371_vm2 = vcmp.lt.s32.totalorder %v952_v8, 127  ;;  %vm411_vm3 = vcmp.lt.s32.totalorder %v952_v8, 112  ;;  %vm391_vm4 = vcmp.lt.s32.totalorder %v952_v8, 113  ;;  %vm339_vm5 = vcmp.lt.s32.totalorder %v952_v8, 1  ;;  %v807_v2 = vld [vmem:[%s1192_s5 + $0x2] sm:$0x3] }
  0x11   : > { %v962_v14 = vrot.slane %v810_v7, %v954_v9  ;;  %v965_v15 = vrot.slane %v810_v7, %v956_v10  ;;  %v969_v16 = vrot.slane %v814_v11, %v954_v9  ;;  %v972_v17 = vrot.slane %v814_v11, %v956_v10 }
  0x12   : > { %v988_v25 = vrot.slane %v811_v18, %v956_v10  ;;  %v997_v29 = vrot.slane %v813_v19, %v954_v9  ;;  %v1000_v30 = vrot.slane %v813_v19, %v956_v10  ;;  %v1003_v31 = vrot.slane %v811_v18, %v954_v9 }
  0x13   : > { %367 = vrot.lane.b32.xlu0 %v918_v0, %s861_s29  ;;  %429 = vrot.lane.b32.xlu1 %v271_v1, %s859_s27  ;;  %v364_v22 = vcombine.low %v962_v14, %v965_v15  ;;  %v1008_v34 = vrot.slane %v812_v26, %v954_v9  ;;  %v1024_v43 = vrot.slane %v812_v26, %v956_v10  ;;  %vm299_vm6 = vcmp.lt.s32.totalorder %v952_v8, 16 }
  0x14   : > { %v1040_v61 = vrot.slane %v809_v55, %v954_v9  ;;  %v1043_v62 = vrot.slane %v809_v55, %v956_v10  ;;  %v1067_v18 = vrot.slane %v807_v2, %v956_v10  ;;  %vm319_vm7 = vcmp.lt.s32.totalorder %v952_v8, 15 }
  0x15   : > { %v366_v35 = vmul.f32 %v364_v22, %v918_v0  ;;  %vm279_vm8 = vcmp.lt.s32.totalorder %v952_v8, 17 }
  0x17   : > { %369 = vrot.lane.b32.xlu1 %v271_v1, %s861_s29  ;;  %409 = vrot.lane.b32.xlu0 %v271_v1, %s860_s28  ;;  %v460_v50 = vcombine.high %v366_v35, %v366_v35 }
  0x1b   : > { %389 = vrot.lane.b32.xlu1 %v271_v1, %s862_s30  ;;  %387 = vrot.lane.b32.xlu0 %v918_v0, %s862_s30 }
  0x1f   : > { %337 = vrot.lane.b32.xlu1 %v271_v1, %s863_s7  ;;  %335 = vrot.lane.b32.xlu0 %v918_v0, %s863_s7 }
  0x23   : > { %297 = vrot.lane.b32.xlu1 %v271_v1, %s864_s8  ;;  %295 = vrot.lane.b32.xlu0 %v918_v0, %s864_s8 }
  0x27   : > { %317 = vrot.lane.b32.xlu1 %v271_v1, %s867_s9  ;;  %315 = vrot.lane.b32.xlu0 %v918_v0, %s867_s9 }
  0x2b   : > { %275 = vrot.lane.b32.xlu1 %v271_v1, %s868_s10  ;;  %273 = vrot.lane.b32.xlu0 %v918_v0, %s868_s10 }
  0x2f   : > { %487 = vperm.xlu0 %841, %v484_v4   ;;  %v808_v4 = vld [vmem:[%s1192_s5 + $0x4] sm:$0x3] }
  0x30   : > { %v1071_v19 = vrot.slane %v808_v4, %v954_v9 }
  0x81   : > { %v428_v12 = vpop.permute.xlu1 %427  ;;  %v408_v13 = vpop.permute.xlu0 %407 }
  0x85   : > { %v368_v20 = vpop.permute.xlu0 %367  ;;  %v430_v21 = vpop.permute.xlu1 %429 }
  0x86   : > { %v432_v23 = vsel %vm431_vm0, %v428_v12, %v430_v21  ;;  %v433_v24 = vsel %vm431_vm0, %v430_v21, %v428_v12  ;;  %v1061_v12 = vrot.slane %v807_v2, %v954_v9 }
  0x87   : > { %v445_v27 = vmul.f32 %v969_v16, %v432_v23  ;;  %v446_v28 = vmul.f32 %v972_v17, %v433_v24 }
  0x89   : > { %815 = vmatprep.subr.msk.mxu0 %vm474_vm1, %v446_v28  ;;  %v370_v32 = vpop.permute.xlu1 %369  ;;  %v410_v33 = vpop.permute.xlu0 %409 }
  0x8a   : > { %v372_v36 = vsel %vm371_vm2, %v368_v20, %v370_v32  ;;  %v373_v37 = vsel %vm371_vm2, %v370_v32, %v368_v20  ;;  %v412_v38 = vsel %vm411_vm3, %v408_v13, %v410_v33  ;;  %v413_v39 = vsel %vm411_vm3, %v410_v33, %v408_v13  ;;  %816 = vmatpush1.msk.msra.mxu0 %vm474_vm1, %v445_v27  ;;  %v252_v13 = vld [vmem:[%s1192_s5] sm:$0x3] }
  0x8b   : > { %v386_v40 = vmul.f32 %v988_v25, %v373_v37  ;;  %v425_v41 = vmul.f32 %v997_v29, %v412_v38  ;;  %v426_v42 = vmul.f32 %v1000_v30, %v413_v39  ;;  %v385_v44 = vmul.f32 %v1003_v31, %v372_v36 }
  0x8c   : > { %v1074_v20 = vrot.slane %v808_v4, %v956_v10  ;;  %v1082_v26 = vrot.slane %v252_v13, %v954_v9  ;;  %v1085_v27 = vrot.slane %v252_v13, %v956_v10 }
  0x8d   : > { %v390_v45 = vpop.permute.xlu1 %389  ;;  %v388_v46 = vpop.permute.xlu0 %387  ;;  %v465_v47 = vrot.slane %v386_v40, 4  ;;  %v470_v51 = vrot.slane %v425_v41, 4  ;;  %v471_v52 = vrot.slane %v426_v42, 4  ;;  %v464_v56 = vrot.slane %v385_v44, 4 }
  0x8e   : > { %v392_v48 = vsel %vm391_vm4, %v388_v46, %v390_v45  ;;  %v393_v49 = vsel %vm391_vm4, %v390_v45, %v388_v46 }
  0x8f   : > { %v405_v53 = vmul.f32 %v1008_v34, %v392_v48  ;;  %v406_v54 = vmul.f32 %v1024_v43, %v393_v49  ;;  %v480_v1 = vsel %vm474_vm1, %v460_v50, %v465_v47  ;;  %v479_v3 = vsel %vm474_vm1, %v366_v35, %v464_v56 }
  0x91   : > { %v338_v57 = vpop.permute.xlu1 %337  ;;  %v336_v58 = vpop.permute.xlu0 %335  ;;  %v482_v59 = vsel %vm474_vm1, %v406_v54, %v471_v52  ;;  %v481_v60 = vsel %vm474_vm1, %v405_v53, %v470_v51  ;;  %v483_v51 = vld [vmem:[%s1188_s1] sm:$0xff] }
  0x92   : > { %524 = vmatprep.subr.mxu0 %v482_v59  ;;  %v340_v63 = vsel %vm339_vm5, %v336_v58, %v338_v57  ;;  %v341_v0 = vsel %vm339_vm5, %v338_v57, %v336_v58 }
  0x93   : > { %525 = vmatpush1.msra.mxu0 %v481_v60  ;;  %v353_v7 = vmul.f32 %v1040_v61, %v341_v0  ;;  %v354_v11 = vmul.f32 %v1043_v62, %v340_v63 }
  0x94   : > { %526 = vmatprep.subr.mxu0 %v480_v1 }
  0x95   : > { %v298_v5 = vpop.permute.xlu1 %297  ;;  %527 = vmatpush1.msra.mxu0 %v479_v3  ;;  %v296_v6 = vpop.permute.xlu0 %295  ;;  %v455_v28 = vrot.slane %v353_v7, 4  ;;  %v456_v32 = vrot.slane %v354_v11, 4 }
  0x96   : > { %v300_v21 = vsel %vm299_vm6, %v296_v6, %v298_v5  ;;  %v301_v22 = vsel %vm299_vm6, %v298_v5, %v296_v6  ;;  %v650_v5 = vld [vmem:[%s1191_s4] sm:$0xff] }
  0x97   : > { %v313_v36 = vmul.f32 %v1061_v12, %v301_v22  ;;  %v314_v37 = vmul.f32 %v1067_v18, %v300_v21 }
  0x99   : > { %v318_v23 = vpop.permute.xlu1 %317  ;;  %v316_v24 = vpop.permute.xlu0 %315  ;;  %v449_v45 = vrot.slane %v313_v36, 4  ;;  %v450_v46 = vrot.slane %v314_v37, 4 }
  0x9a   : > { %v320_v33 = vsel %vm319_vm7, %v316_v24, %v318_v23  ;;  %v321_v35 = vsel %vm319_vm7, %v318_v23, %v316_v24 }
  0x9b   : > { %v333_v38 = vmul.f32 %v1071_v19, %v321_v35  ;;  %v334_v9 = vmul.f32 %v1074_v20, %v320_v33 }
  0x9d   : > { %v276_v39 = vpop.permute.xlu1 %275  ;;  %v274_v40 = vpop.permute.xlu0 %273  ;;  %v478_v10 = vsel %vm474_vm1, %v334_v9, %v456_v32  ;;  %v477_v41 = vsel %vm474_vm1, %v333_v38, %v455_v28 }
  0x9e   : > { %v280_v42 = vsel %vm279_vm8, %v274_v40, %v276_v39  ;;  %v281_v44 = vsel %vm279_vm8, %v276_v39, %v274_v40  ;;  %528 = vmatprep.subr.mxu0 %v478_v10 }
  0x9f   : > { %v293_v47 = vmul.f32 %v1082_v26, %v281_v44  ;;  %v294_v48 = vmul.f32 %v1085_v27, %v280_v42  ;;  %529 = vmatpush1.msra.mxu0 %v477_v41 }
  0xa1   : > { %v476_v49 = vsel %vm474_vm1, %v294_v48, %v450_v46  ;;  %v475_v50 = vsel %vm474_vm1, %v293_v47, %v449_v45 }
  0xa2   : > { %530 = vmatprep.subr.mxu0 %v476_v49 }
  0xa3   : > { %531 = vmatpush1.msra.mxu0 %v475_v50 }
  0xa4   : > { %817 = vmatmul.mubr.msk.f32.vlgmr.msra.gmra.mxu0 %vm490_vm9, %v483_v51 }
  0xaa   : > { %v488_v52 = vpop.permute.xlu0 %487 }
 0x164   : > { %v566_v53 = vpop.f32.mrf.mxu0 }
 0x165   : > { %v567_v54 = vadd.f32 %v566_v53, %v488_v52 }
 0x166   : > { %v568_v55 = vpop.f32.mrf.mxu0 }
 0x167   : > { %v573_v56 = vmul.f32 0.70710677, %v567_v54  ;;  %v569_v57 = vadd.f32 %v568_v55, %v488_v52  ;;  %v571_v60 = vmul.f32 0.5, %v567_v54 }
 0x169   : > { %843 = verf.f32 %v573_v56  ;;  %v574_v58 = vmul.f32 0.70710677, %v569_v57  ;;  %v572_v3 = vmul.f32 0.5, %v569_v57 }
 0x16b   : > { %845 = verf.f32 %v574_v58 }
 0x176   : > { %v844_v59 = vpop.eup %843 }
 0x177   : > { %v577_v63 = vadd.f32 1.0, %v844_v59 }
 0x178   : > { %v846_v0 = vpop.eup %845 }
 0x179   : > { %v579_v1 = vmul.f32 %v577_v63, %v571_v60  ;;  %v578_v2 = vadd.f32 1.0, %v846_v0 }
 0x17b   : > { %633 = vrot.lane.b32.xlu0 %v579_v1, %s860_s28  ;;  %641 = vrot.lane.b32.xlu1 %v579_v1, %s859_s27  ;;  %v580_v4 = vmul.f32 %v578_v2, %v572_v3  ;;  %v615_v47 = vmul.f32 %v579_v1, %v962_v14 }
 0x17f   : > { %625 = vrot.lane.b32.xlu0 %v579_v1, %s862_s30  ;;  %643 = vrot.lane.b32.xlu1 %v580_v4, %s859_s27 }
 0x183   : > { %617 = vrot.lane.b32.xlu0 %v579_v1, %s861_s29  ;;  %635 = vrot.lane.b32.xlu1 %v580_v4, %s860_s28 }
 0x187   : > { %605 = vrot.lane.b32.xlu0 %v579_v1, %s863_s7  ;;  %627 = vrot.lane.b32.xlu1 %v580_v4, %s862_s30  ;;  %s822_s30 = sshll.u32 %s1195_s22, 4 }
 0x18b   : > { %597 = vrot.lane.b32.xlu0 %v579_v1, %s867_s9  ;;  %619 = vrot.lane.b32.xlu1 %v580_v4, %s861_s29 }
 0x18f   : > { %589 = vrot.lane.b32.xlu0 %v579_v1, %s864_s8  ;;  %607 = vrot.lane.b32.xlu1 %v580_v4, %s863_s7 }
 0x193   : > { %581 = vrot.lane.b32.xlu0 %v579_v1, %s868_s10  ;;  %599 = vrot.lane.b32.xlu1 %v580_v4, %s867_s9  ;;  %s251_s9 = scalar_lea.vmem %s1193_s6, %s822_s30 }
 0x197   : > { %653 = vperm.xlu0 %841, %v650_v5   ;;  %591 = vrot.lane.b32.xlu1 %v580_v4, %s864_s8 }
 0x19b   : > { %583 = vrot.lane.b32.xlu1 %v580_v4, %s868_s10 }
 0x1ed   : > { %v634_v6 = vpop.permute.xlu0 %633  ;;  %v642_v7 = vpop.permute.xlu1 %641 }
 0x1f1   : > { %v626_v11 = vpop.permute.xlu0 %625  ;;  %v644_v13 = vpop.permute.xlu1 %643 }
 0x1f2   : > { %v645_v21 = vsel %vm431_vm0, %v642_v7, %v644_v13  ;;  %v646_v22 = vsel %vm431_vm0, %v644_v13, %v642_v7 }
 0x1f3   : > { %v648_v23 = vmul.f32 %v646_v22, %v972_v17  ;;  %v647_v24 = vmul.f32 %v645_v21, %v969_v16 }
 0x1f5   : > { %v618_v28 = vpop.permute.xlu0 %617  ;;  %674 = vmatprep.subr.mxu1 %v648_v23  ;;  %v636_v32 = vpop.permute.xlu1 %635 }
 0x1f6   : > { %v637_v33 = vsel %vm411_vm3, %v634_v6, %v636_v32  ;;  %v638_v35 = vsel %vm411_vm3, %v636_v32, %v634_v6  ;;  %675 = vmatpush1.msra.mxu1 %v647_v24 }
 0x1f7   : > { %v639_v36 = vmul.f32 %v637_v33, %v997_v29  ;;  %v640_v37 = vmul.f32 %v638_v35, %v1000_v30 }
 0x1f9   : > { %676 = vmatprep.subr.mxu1 %v640_v37  ;;  %v628_v38 = vpop.permute.xlu1 %627  ;;  %v606_v9 = vpop.permute.xlu0 %605 }
 0x1fa   : > { %v629_v17 = vsel %vm391_vm4, %v626_v11, %v628_v38  ;;  %v630_v16 = vsel %vm391_vm4, %v628_v38, %v626_v11  ;;  %677 = vmatpush1.msra.mxu1 %v639_v36 }
 0x1fb   : > { %v631_v39 = vmul.f32 %v629_v17, %v1008_v34  ;;  %v632_v40 = vmul.f32 %v630_v16, %v1024_v43  ;;  %v616_v34 = vmul.f32 %v580_v4, %v965_v15 }
 0x1fd   : > { %678 = vmatprep.subr.mxu1 %v632_v40  ;;  %v620_v10 = vpop.permute.xlu1 %619  ;;  %v598_v44 = vpop.permute.xlu0 %597 }
 0x1fe   : > { %v621_v29 = vsel %vm371_vm2, %v618_v28, %v620_v10  ;;  %v622_v30 = vsel %vm371_vm2, %v620_v10, %v618_v28  ;;  %679 = vmatpush1.msra.mxu1 %v631_v39 }
 0x1ff   : > { %v623_v41 = vmul.f32 %v621_v29, %v1003_v31  ;;  %v624_v42 = vmul.f32 %v622_v30, %v988_v25 }
 0x201   : > { %680 = vmatprep.subr.mxu1 %v624_v42  ;;  %v608_v45 = vpop.permute.xlu1 %607  ;;  %v590_v50 = vpop.permute.xlu0 %589 }
 0x202   : > { %v609_v43 = vsel %vm339_vm5, %v606_v9, %v608_v45  ;;  %v610_v46 = vsel %vm339_vm5, %v608_v45, %v606_v9  ;;  %681 = vmatpush1.msra.mxu1 %v623_v41 }
 0x203   : > { %v611_v48 = vmul.f32 %v610_v46, %v1040_v61  ;;  %v612_v31 = vmul.f32 %v609_v43, %v1043_v62  ;;  %682 = vmatprep.subr.mxu1 %v616_v34 }
 0x204   : > { %683 = vmatpush1.msra.mxu1 %v615_v47 }
 0x205   : > { %v600_v25 = vpop.permute.xlu1 %599  ;;  %684 = vmatprep.subr.mxu1 %v612_v31  ;;  %v582_v55 = vpop.permute.xlu0 %581 }
 0x206   : > { %v601_v15 = vsel %vm319_vm7, %v598_v44, %v600_v25  ;;  %v602_v49 = vsel %vm319_vm7, %v600_v25, %v598_v44  ;;  %685 = vmatpush1.msra.mxu1 %v611_v48 }
 0x207   : > { %v603_v51 = vmul.f32 %v602_v49, %v1071_v19  ;;  %v604_v14 = vmul.f32 %v601_v15, %v1074_v20 }
 0x209   : > { %v592_v52 = vpop.permute.xlu1 %591  ;;  %686 = vmatprep.subr.mxu1 %v604_v14 }
 0x20a   : > { %v593_v61 = vsel %vm299_vm6, %v590_v50, %v592_v52  ;;  %v594_v62 = vsel %vm299_vm6, %v592_v52, %v590_v50  ;;  %687 = vmatpush1.msra.mxu1 %v603_v51 }
 0x20b   : > { %v595_v53 = vmul.f32 %v594_v62, %v1061_v12  ;;  %v596_v54 = vmul.f32 %v593_v61, %v1067_v18  ;;  %v649_v12 = vld [vmem:[%s1190_s3] sm:$0xff] }
 0x20d   : > { %v584_v56 = vpop.permute.xlu1 %583  ;;  %688 = vmatprep.subr.mxu1 %v596_v54 }
 0x20e   : > { %v585_v19 = vsel %vm279_vm8, %v582_v55, %v584_v56  ;;  %v586_v20 = vsel %vm279_vm8, %v584_v56, %v582_v55  ;;  %689 = vmatpush1.msra.mxu1 %v595_v53 }
 0x20f   : > { %v587_v57 = vmul.f32 %v586_v20, %v1082_v26  ;;  %v588_v58 = vmul.f32 %v585_v19, %v1085_v27 }
 0x211   : > { %690 = vmatprep.subr.mxu1 %v588_v58 }
 0x212   : > { %691 = vmatpush1.msra.mxu1 %v587_v57  ;;  %v654_v18 = vpop.permute.xlu0 %653 }
 0x213   : > { %818 = vmatmul.mubr.msk.f32.vlgmr.msra.gmra.mxu1 %vm656_vm10, %v649_v12 }
 0x2d3   : > { %v726_v59 = vpop.f32.mrf.mxu1 }
 0x2d4   : > { %v727_v60 = vadd.f32 %v726_v59, %v654_v18 }
 0x2d5   : > { %v728_v63 = vpop.f32.mrf.mxu1 }
 0x2d6   : > { %v733_v8 = vmul.f32 0.70710677, %v727_v60  ;;  %v729_v0 = vadd.f32 %v728_v63, %v654_v18  ;;  %v731_v27 = vmul.f32 0.5, %v727_v60 }
 0x2d8   : > { %847 = verf.f32 %v733_v8  ;;  %v734_v1 = vmul.f32 0.70710677, %v729_v0  ;;  %v732_v5 = vmul.f32 0.5, %v729_v0 }
 0x2da   : > { %849 = verf.f32 %v734_v1 }
 0x2e5   : > { %v848_v26 = vpop.eup %847 }
 0x2e6   : > { %v737_v2 = vadd.f32 1.0, %v848_v26 }
 0x2e7   : > { %v850_v3 = vpop.eup %849 }
 0x2e8   : > { %v739_v4 = vmul.f32 %v737_v2, %v731_v27  ;;  %v738_v6 = vadd.f32 1.0, %v850_v3 }
 0x2ea   : > { %741 = vst [vmem:[%s251_s9] sm:$0xff] %v739_v4  ;;  %v740_v7 = vmul.f32 %v738_v6, %v732_v5 }
 0x2ec   : > { %742 = vst [vmem:[%s251_s9 + $0x8] sm:$0xff] %v740_v7 }
 0x2ed PF: > { %s16_s21 = sadd.s32 1, %s857_s21  }
 0x2ee   : > { %p13_p4 = scmp.ge.s32.totalorder %s16_s21, 4  }
 0x2f0   :  { %15 = sbr.rel (!%p13_p4) target bundleno = 1 (0x1), region = 82 }

</bundles_post_ra>
